<compile_context>
chip_gen: v5e
topology: v5e:2x2
jax: 0.10.0
libtpu: 0.0.40
codegen_flags: <defaults>
</compile_context>

<pallas_src>
import math

import jax
import jax.numpy as jnp
from jax.experimental import pallas as pl
from jax.experimental.pallas import tpu as pltpu

LOG2PI = math.log(2.0 * math.pi)


def _round_up(x, m):
    return ((int(x) + m - 1) // m) * m


def _choose_batch_tile(batch, *, lane=256, cap=8192):
    """Lane-dense batch tile.

    As large as useful (amortizes the ~0.35us/step pipeline overhead), capped
    at 8192 so the per-tile VMEM footprint (~6 MB incl. double buffers) stays
    well under even v5e's 16 MiB scoped default, and split into >=2 tiles when
    the whole batch would otherwise fit in one (keeps both v7x TCs busy).
    """
    full = _round_up(max(batch, 1), lane)
    tb = min(cap, full)
    if full <= cap and tb >= 2 * lane:
        tb = _round_up(-(-batch // 2), lane)
    return max(lane, tb)


# ---------------------------------------------------------------------------
# Kernel
# ---------------------------------------------------------------------------
def _make_kernel(flow_depth: int, latent: int, hidden: int):
    D, H, K = latent, hidden, flow_depth
    has_odd = K >= 2              # any odd (reversed-frame) layers at all?
    final_flip = (K % 2) == 1     # overall parity of the Reverse chain

    def kernel(io_ref,                     # (2, D, TB): [nu ; z], batch-last
               mix_ref,                    # (6, D, 1) branch tables (base/delta)
               w1v_ref, b1_ref,            # (K, H, 2D), (K, H, 1)
               w2_ref, b2_ref,             # (K, 2D, H), (K, 2D, 1)
               rmat_ref,                   # (D, D) flip permutation
               out_ref):                   # (2, D, TB): [nu_0 ; log_r]
        nu = io_ref[0]                                    # (D, TB) f32
        z = io_ref[1]                                     # (D, TB)
        sel = (z > 0.0).astype(jnp.float32)               # branch indicator

        # ---- r_nu_last : BinaryMixtureTransform (precomputed branch tables,
        #      arithmetic select: base + sel*delta; shift*inv_scale prefused) ----
        inv_scale = mix_ref[0] + sel * mix_ref[1]         # (D, TB)
        shift_inv = mix_ref[2] + sel * mix_ref[3]
        acc_even = mix_ref[4] + sel * mix_ref[5]          # -log(scale)

        x = nu * inv_scale - shift_inv                    # nu_K

        # ---- r_nu_first : [IAF, Reverse] x K, Reverse folded into weights ----
        acc_odd = jnp.zeros_like(nu) if has_odd else None
        for l in range(K):
            xz = jnp.concatenate([x, z], axis=0)          # (2D, TB)
            h = jnp.tanh(
                jnp.dot(w1v_ref[l], xz, preferred_element_type=jnp.float32)
                + b1_ref[l])                              # (H, TB)
            ms = (jnp.dot(w2_ref[l], h, preferred_element_type=jnp.float32)
                  + b2_ref[l])                            # (2D, TB)
            m = ms[:D, :]
            s = ms[D:, :] + 2.0                           # sigmoid-arg bias
            # One shared EUP exp for sigmoid(s) and softplus(-s); clamp guards
            # exp overflow (only changes results for s < -30, where softplus
            # has saturated anyway).
            e = jnp.exp(-jnp.maximum(s, -30.0))
            r = pl.reciprocal(1.0 + e, approx=True)
            gate = r * (2.0 - (1.0 + e) * r)              # one NR step -> f32-exact
            x = m + gate * (x - m)                        # gate*x + (1-gate)*m
            contrib = jnp.log1p(e)                        # softplus(-s)
            if l % 2 == 1:
                acc_odd = acc_odd + contrib               # un-reversed frame
            else:
                acc_even = acc_even + contrib

        log_r = acc_even
        if has_odd:
            # Odd layers' per-element log terms were produced in the un-reversed
            # frame; one tiny 8x8 flip matmul restores FlowSequential alignment.
            log_r = log_r + jnp.dot(rmat_ref[...], acc_odd,
                                    preferred_element_type=jnp.float32)
        if final_flip:
            x = jnp.dot(rmat_ref[...], x, preferred_element_type=jnp.float32)

        out_ref[0] = x                                             # nu_0
        out_ref[1] = log_r + (-0.5 * LOG2PI - 0.5 * x * x)         # total log r

    return kernel


# ---------------------------------------------------------------------------
# Parameters
# ---------------------------------------------------------------------------
def init_params(key, latent, hidden, flow_depth, num_components):
    """Raw ("math"-layout) parameters, used by the pure-JAX reference."""
    D, H, K, C = latent, hidden, flow_depth, num_components
    ks = jax.random.split(key, 7)
    sc = 0.1

    # MADE autoregressive masks (degrees 1..D on inputs/outputs, cyclic hidden)
    in_deg = jnp.arange(1, D + 1)
    hid_deg = jnp.arange(H) % (D - 1) + 1
    mask1 = (hid_deg[:, None] >= in_deg[None, :]).astype(jnp.float32)   # (H, D)
    mask2 = (in_deg[:, None] > hid_deg[None, :]).astype(jnp.float32)    # (D, H)

    return dict(
        w1=jax.random.normal(ks[0], (K, H, D), jnp.float32) * sc * mask1,
        v=jax.random.normal(ks[1], (K, H, D), jnp.float32) * sc,
        b1=jnp.zeros((K, H), jnp.float32),
        w2m=jax.random.normal(ks[2], (K, D, H), jnp.float32) * sc * mask2,
        w2s=jax.random.normal(ks[3], (K, D, H), jnp.float32) * sc * mask2,
        b2m=jnp.zeros((K, D), jnp.float32),
        b2s=jnp.zeros((K, D), jnp.float32),
        # mixture params: leading axis = branch (z<=0 / z>0), then component C
        mixlog=jax.random.normal(ks[4], (2, C, D), jnp.float32) * sc,
        mixscale=jax.random.normal(ks[5], (2, C, D), jnp.float32) * sc + 1.0,
        mixshift=jax.random.normal(ks[6], (2, C, D), jnp.float32) * sc,
    )


def pack_params(raw):
    """Host-side precompute: mixture branch tables, folded & fused weights."""
    w1 = raw["w1"]
    K, H, D = w1.shape
    flip = jnp.arange(D - 1, -1, -1)

    w1v_f, b1_f, w2_f, b2_f = [], [], [], []
    for l in range(K):
        w1_l, v_l = w1[l], raw["v"][l]
        w2m_l, w2s_l = raw["w2m"][l], raw["w2s"][l]
        b2m_l, b2s_l = raw["b2m"][l], raw["b2s"][l]
        if l % 2 == 1:
            # Fold the cumulative Reverse permutation into odd layers:
            # input side -> permute D-columns of W1 (context z is NOT reversed);
            # output side -> permute rows of W2m/W2s and biases.
            w1_l = w1_l[:, flip]
            w2m_l, w2s_l = w2m_l[flip, :], w2s_l[flip, :]
            b2m_l, b2s_l = b2m_l[flip], b2s_l[flip]
        w1v_f.append(jnp.concatenate([w1_l, v_l], axis=1))             # (H, 2D)
        b1_f.append(raw["b1"][l][:, None])                             # (H, 1)
        w2_f.append(jnp.concatenate([w2m_l, w2s_l], axis=0))           # (2D, H)
        b2_f.append(jnp.concatenate([b2m_l, b2s_l], axis=0)[:, None])  # (2D, 1)

    # BinaryMixtureTransform branch tables (depend only on the sign of z),
    # stored as base + delta so the kernel uses FMAs instead of selects.
    w = jax.nn.softmax(raw["mixlog"], axis=1)                             # (2,C,D)
    scale = jnp.sum(w * jax.nn.softplus(raw["mixscale"]), axis=1) + 1e-6  # (2, D)
    shift = jnp.sum(w * raw["mixshift"], axis=1)                          # (2, D)
    inv_scale = 1.0 / scale
    shift_inv = shift * inv_scale
    neg_log_scale = -jnp.log(scale)
    mix = jnp.stack([
        inv_scale[0], inv_scale[1] - inv_scale[0],
        shift_inv[0], shift_inv[1] - shift_inv[0],
        neg_log_scale[0], neg_log_scale[1] - neg_log_scale[0],
    ])[:, :, None]                                                        # (6,D,1)

    return dict(
        mix=mix.astype(jnp.float32),                     # (6, D, 1)
        w1v=jnp.stack(w1v_f).astype(jnp.float32),        # (K, H, 2D)
        b1=jnp.stack(b1_f).astype(jnp.float32),          # (K, H, 1)
        w2=jnp.stack(w2_f).astype(jnp.float32),          # (K, 2D, H)
        b2=jnp.stack(b2_f).astype(jnp.float32),          # (K, 2D, 1)
        rmat=jnp.eye(D, dtype=jnp.float32)[::-1],        # (D, D)
    )


# ---------------------------------------------------------------------------
# Wrapper
# ---------------------------------------------------------------------------
def mixture_posterior_forward(nu_L_plus_K, z, packed, *, batch_tile=None,
                              batch_last=False):
    """Forward pass.

    Default I/O layout matches PyTorch ([batch, latent]).  Pass
    batch_last=True to feed/return (latent, batch) arrays directly and skip
    the wrapper-side transposes (recommended for production: keep the data
    batch-last end-to-end; the kernel is lane-dense in that layout).
    """
    if batch_last:
        D, B = nu_L_plus_K.shape
        nu_t, z_t = nu_L_plus_K, z
    else:
        B, D = nu_L_plus_K.shape
        nu_t, z_t = nu_L_plus_K.T, z.T

    K, H, _ = packed["w1v"].shape
    TB = int(batch_tile) if batch_tile is not None else _choose_batch_tile(B)
    n_b = -(-B // TB)
    Bp = n_b * TB

    # One stacked, batch-last, lane-dense input stream.  Padding uses nu=z=0
    # -> branch 0, finite math, results discarded.
    io = jnp.stack([nu_t, z_t]).astype(jnp.float32)          # (2, D, B)
    io = jnp.pad(io, ((0, 0), (0, 0), (0, Bp - B)))

    kernel = _make_kernel(K, D, H)

    data_spec = pl.BlockSpec((2, D, TB), lambda i: (0, 0, i))

    def const_spec(a):
        rank = a.ndim
        return pl.BlockSpec(tuple(a.shape), lambda i, _r=rank: (0,) * _r)

    const_names = ("mix", "w1v", "b1", "w2", "b2", "rmat")
    in_specs = [data_spec] + [const_spec(packed[k]) for k in const_names]
    out_spec = pl.BlockSpec((2, D, TB), lambda i: (0, 0, i))

    weight_bytes = int(sum(int(packed[k].size) for k in const_names)) * 4
    flops = int(8 * Bp * K * H * D)                      # two fused dots / layer
    transcendentals = int(Bp * K * (H + 3 * D))          # tanh + exp + log1p + rcp
    bytes_accessed = int(2 * (2 * D * Bp * 4) + weight_bytes)

    out = pl.pallas_call(
        kernel,
        out_shape=jax.ShapeDtypeStruct((2, D, Bp), jnp.float32),
        grid_spec=pltpu.PrefetchScalarGridSpec(
            num_scalar_prefetch=0,
            grid=(n_b,),
            in_specs=in_specs,
            out_specs=out_spec),
        compiler_params=pltpu.CompilerParams(
            dimension_semantics=("parallel",),
            vmem_limit_bytes=32 * 1024 * 1024),
        cost_estimate=pl.CostEstimate(
            flops=flops,
            transcendentals=transcendentals,
            bytes_accessed=bytes_accessed),
    )(io, *(packed[k] for k in const_names))

    nu_0 = out[0, :, :B]
    log_r = out[1, :, :B]
    if not batch_last:
        nu_0, log_r = nu_0.T, log_r.T
    return nu_0, log_r


# ---------------------------------------------------------------------------
# Pure-JAX reference (original, unfused formulation) for validation
# ---------------------------------------------------------------------------
def reference_forward(nu, z, raw):
    K, H, D = raw["w1"].shape
    HP = jax.lax.Precision.HIGHEST
    sel = (z > 0.0)[:, None, :]                                            # (B,1,D)

    logit = jnp.where(sel, raw["mixlog"][1][None], raw["mixlog"][0][None])  # (B,C,D)
    w = jax.nn.softmax(logit, axis=1)
    rawscale = jnp.where(sel, raw["mixscale"][1][None], raw["mixscale"][0][None])
    rawshift = jnp.where(sel, raw["mixshift"][1][None], raw["mixshift"][0][None])
    scale = jnp.sum(w * jax.nn.softplus(rawscale), axis=1) + 1e-6
    shift = jnp.sum(w * rawshift, axis=1)

    x = (nu - shift) / scale
    log_r = -jnp.log(scale)
    for l in range(K):
        h = jnp.tanh(jnp.dot(x, raw["w1"][l].T, precision=HP)
                     + jnp.dot(z, raw["v"][l].T, precision=HP)
                     + raw["b1"][l][None, :])
        m = jnp.dot(h, raw["w2m"][l].T, precision=HP) + raw["b2m"][l][None, :]
        s = jnp.dot(h, raw["w2s"][l].T, precision=HP) + raw["b2s"][l][None, :] + 2.0
        gate = jax.nn.sigmoid(s)
        x = gate * x + (1.0 - gate) * m
        log_r = log_r + jax.nn.softplus(-s)
        x = x[:, ::-1]                       # Reverse(latent)
    log_r = log_r + (-0.5 * math.log(2.0 * math.pi) - 0.5 * x * x)
    return x, log_r


# ---------------------------------------------------------------------------
if __name__ == "__main__":
    # latent_size=8, hidden_size=32, flow_depth=2, num_components=3, batch=4
    B, D, H, K, C = 4, 8, 32, 2, 3

    key = jax.random.PRNGKey(0)
    k_nu, k_z, k_p = jax.random.split(key, 3)
    nu_L_plus_K = jax.random.normal(k_nu, (B, D), jnp.float32)
    z = jax.random.normal(k_z, (B, D), jnp.float32)

    raw = init_params(k_p, D, H, K, C)
    packed = pack_params(raw)

    nu_0, log_r = mixture_posterior_forward(nu_L_plus_K, z, packed)
    jax.block_until_ready((nu_0, log_r))

    assert nu_0.shape == (B, D) and log_r.shape == (B, D)
    assert bool(jnp.all(jnp.isfinite(nu_0))) and bool(jnp.all(jnp.isfinite(log_r)))

    ref_nu0, ref_logr = reference_forward(nu_L_plus_K, z, raw)
    err = max(float(jnp.max(jnp.abs(nu_0 - ref_nu0))),
              float(jnp.max(jnp.abs(log_r - ref_logr))))
    assert err < 2e-3, f"kernel/reference mismatch: max abs err = {err}"

    # Exercise the multi-tile grid path (adaptive tile -> 2 tiles + padding).
    B2 = 600
    k_nu2, k_z2 = jax.random.split(jax.random.PRNGKey(1), 2)
    nu2 = jax.random.normal(k_nu2, (B2, D), jnp.float32)
    z2 = jax.random.normal(k_z2, (B2, D), jnp.float32)
    nu0_2, logr_2 = mixture_posterior_forward(nu2, z2, packed)
    jax.block_until_ready((nu0_2, logr_2))
    ref_nu0_2, ref_logr_2 = reference_forward(nu2, z2, raw)
    err2 = max(float(jnp.max(jnp.abs(nu0_2 - ref_nu0_2))),
               float(jnp.max(jnp.abs(logr_2 - ref_logr_2))))
    assert err2 < 2e-3, f"multi-tile kernel/reference mismatch: max abs err = {err2}"

    print("KERNEL_OK")
</pallas_src>

<mosaic_0001>
module attributes {stable_mosaic.version = 11 : i64} {
  func.func @kernel(%arg0: i32, %arg1: memref<2x8x256xf32, #tpu.memory_space<vmem>>, %arg2: memref<6x8x1xf32, #tpu.memory_space<vmem>>, %arg3: memref<2x32x16xf32, #tpu.memory_space<vmem>>, %arg4: memref<2x32x1xf32, #tpu.memory_space<vmem>>, %arg5: memref<2x16x32xf32, #tpu.memory_space<vmem>>, %arg6: memref<2x16x1xf32, #tpu.memory_space<vmem>>, %arg7: memref<8x8xf32, #tpu.memory_space<vmem>>, %arg8: memref<2x8x256xf32, #tpu.memory_space<vmem>>) attributes {dimension_semantics = [#tpu.dimension_semantics<parallel>], iteration_bounds = array<i64: 1>, scalar_prefetch = 0 : i64, scratch_operands = 0 : i64, tpu.core_type = #tpu.core_type<tc>, window_params = [{transform_indices = @transform_0, window_bounds = array<i64: 2, 8, 256>}, {pipeline_mode = #tpu.pipeline_mode<synchronous>, transform_indices = @transform_1, window_bounds = array<i64: 6, 8, 1>}, {pipeline_mode = #tpu.pipeline_mode<synchronous>, transform_indices = @transform_2, window_bounds = array<i64: 2, 32, 16>}, {pipeline_mode = #tpu.pipeline_mode<synchronous>, transform_indices = @transform_3, window_bounds = array<i64: 2, 32, 1>}, {pipeline_mode = #tpu.pipeline_mode<synchronous>, transform_indices = @transform_4, window_bounds = array<i64: 2, 16, 32>}, {pipeline_mode = #tpu.pipeline_mode<synchronous>, transform_indices = @transform_5, window_bounds = array<i64: 2, 16, 1>}, {pipeline_mode = #tpu.pipeline_mode<synchronous>, transform_indices = @transform_6, window_bounds = array<i64: 8, 8>}, {transform_indices = @transform_7, window_bounds = array<i64: 2, 8, 256>}]} {
    %c0 = arith.constant 0 : index
    %c0_0 = arith.constant 0 : index
    %c0_1 = arith.constant 0 : index
    %0 = vector.load %arg1[%c0, %c0_0, %c0_1] : memref<2x8x256xf32, #tpu.memory_space<vmem>>, vector<1x8x256xf32>
    %1 = vector.shape_cast %0 : vector<1x8x256xf32> to vector<8x256xf32>
    %c1 = arith.constant 1 : index
    %c0_2 = arith.constant 0 : index
    %c0_3 = arith.constant 0 : index
    %2 = vector.load %arg1[%c1, %c0_2, %c0_3] : memref<2x8x256xf32, #tpu.memory_space<vmem>>, vector<1x8x256xf32>
    %3 = vector.shape_cast %2 : vector<1x8x256xf32> to vector<8x256xf32>
    %cst = arith.constant 0.000000e+00 : f32
    %4 = vector.broadcast %cst : f32 to vector<8x256xf32>
    %5 = arith.cmpf ogt, %3, %4 : vector<8x256xf32>
    %6 = arith.extui %5 : vector<8x256xi1> to vector<8x256xi32>
    %7 = arith.sitofp %6 : vector<8x256xi32> to vector<8x256xf32>
    %c0_4 = arith.constant 0 : index
    %c0_5 = arith.constant 0 : index
    %c0_6 = arith.constant 0 : index
    %8 = vector.load %arg2[%c0_4, %c0_5, %c0_6] : memref<6x8x1xf32, #tpu.memory_space<vmem>>, vector<1x8x1xf32>
    %9 = vector.shape_cast %8 : vector<1x8x1xf32> to vector<8x1xf32>
    %c1_7 = arith.constant 1 : index
    %c0_8 = arith.constant 0 : index
    %c0_9 = arith.constant 0 : index
    %10 = vector.load %arg2[%c1_7, %c0_8, %c0_9] : memref<6x8x1xf32, #tpu.memory_space<vmem>>, vector<1x8x1xf32>
    %11 = vector.shape_cast %10 : vector<1x8x1xf32> to vector<8x1xf32>
    %12 = vector.broadcast %11 : vector<8x1xf32> to vector<8x256xf32>
    %13 = arith.mulf %7, %12 : vector<8x256xf32>
    %14 = vector.broadcast %9 : vector<8x1xf32> to vector<8x256xf32>
    %15 = arith.addf %14, %13 : vector<8x256xf32>
    %c2 = arith.constant 2 : index
    %c0_10 = arith.constant 0 : index
    %c0_11 = arith.constant 0 : index
    %16 = vector.load %arg2[%c2, %c0_10, %c0_11] : memref<6x8x1xf32, #tpu.memory_space<vmem>>, vector<1x8x1xf32>
    %17 = vector.shape_cast %16 : vector<1x8x1xf32> to vector<8x1xf32>
    %c3 = arith.constant 3 : index
    %c0_12 = arith.constant 0 : index
    %c0_13 = arith.constant 0 : index
    %18 = vector.load %arg2[%c3, %c0_12, %c0_13] : memref<6x8x1xf32, #tpu.memory_space<vmem>>, vector<1x8x1xf32>
    %19 = vector.shape_cast %18 : vector<1x8x1xf32> to vector<8x1xf32>
    %20 = vector.broadcast %19 : vector<8x1xf32> to vector<8x256xf32>
    %21 = arith.mulf %7, %20 : vector<8x256xf32>
    %22 = vector.broadcast %17 : vector<8x1xf32> to vector<8x256xf32>
    %23 = arith.addf %22, %21 : vector<8x256xf32>
    %c4 = arith.constant 4 : index
    %c0_14 = arith.constant 0 : index
    %c0_15 = arith.constant 0 : index
    %24 = vector.load %arg2[%c4, %c0_14, %c0_15] : memref<6x8x1xf32, #tpu.memory_space<vmem>>, vector<1x8x1xf32>
    %25 = vector.shape_cast %24 : vector<1x8x1xf32> to vector<8x1xf32>
    %c5 = arith.constant 5 : index
    %c0_16 = arith.constant 0 : index
    %c0_17 = arith.constant 0 : index
    %26 = vector.load %arg2[%c5, %c0_16, %c0_17] : memref<6x8x1xf32, #tpu.memory_space<vmem>>, vector<1x8x1xf32>
    %27 = vector.shape_cast %26 : vector<1x8x1xf32> to vector<8x1xf32>
    %28 = vector.broadcast %27 : vector<8x1xf32> to vector<8x256xf32>
    %29 = arith.mulf %7, %28 : vector<8x256xf32>
    %30 = vector.broadcast %25 : vector<8x1xf32> to vector<8x256xf32>
    %31 = arith.addf %30, %29 : vector<8x256xf32>
    %32 = arith.mulf %1, %15 : vector<8x256xf32>
    %33 = arith.subf %32, %23 : vector<8x256xf32>
    %cst_18 = arith.constant 0.000000e+00 : f32
    %34 = vector.broadcast %cst_18 : f32 to vector<8x256xf32>
    %35 = tpu.concatenate %33, %3 in 0 : vector<8x256xf32>, vector<8x256xf32> -> vector<16x256xf32>
    %c0_19 = arith.constant 0 : index
    %c0_20 = arith.constant 0 : index
    %c0_21 = arith.constant 0 : index
    %36 = vector.load %arg3[%c0_19, %c0_20, %c0_21] : memref<2x32x16xf32, #tpu.memory_space<vmem>>, vector<1x32x16xf32>
    %37 = vector.shape_cast %36 : vector<1x32x16xf32> to vector<32x16xf32>
    %cst_22 = arith.constant dense<0.000000e+00> : vector<32x256xf32>
    %38 = tpu.matmul %37, %35, %cst_22 {dimension_numbers = #tpu.dot_dimension_numbers<[1], [0], [0], [1], [0, 0, 1, 1], [], []>} : vector<32x16xf32>, vector<16x256xf32>, vector<32x256xf32> -> vector<32x256xf32>
    %c0_23 = arith.constant 0 : index
    %c0_24 = arith.constant 0 : index
    %c0_25 = arith.constant 0 : index
    %39 = vector.load %arg4[%c0_23, %c0_24, %c0_25] : memref<2x32x1xf32, #tpu.memory_space<vmem>>, vector<1x32x1xf32>
    %40 = vector.shape_cast %39 : vector<1x32x1xf32> to vector<32x1xf32>
    %41 = vector.broadcast %40 : vector<32x1xf32> to vector<32x256xf32>
    %42 = arith.addf %38, %41 : vector<32x256xf32>
    %43 = math.tanh %42 : vector<32x256xf32>
    %c0_26 = arith.constant 0 : index
    %c0_27 = arith.constant 0 : index
    %c0_28 = arith.constant 0 : index
    %44 = vector.load %arg5[%c0_26, %c0_27, %c0_28] : memref<2x16x32xf32, #tpu.memory_space<vmem>>, vector<1x16x32xf32>
    %45 = vector.shape_cast %44 : vector<1x16x32xf32> to vector<16x32xf32>
    %cst_29 = arith.constant dense<0.000000e+00> : vector<16x256xf32>
    %46 = tpu.matmul %45, %43, %cst_29 {dimension_numbers = #tpu.dot_dimension_numbers<[1], [0], [0], [1], [0, 0, 1, 1], [], []>} : vector<16x32xf32>, vector<32x256xf32>, vector<16x256xf32> -> vector<16x256xf32>
    %c0_30 = arith.constant 0 : index
    %c0_31 = arith.constant 0 : index
    %c0_32 = arith.constant 0 : index
    %47 = vector.load %arg6[%c0_30, %c0_31, %c0_32] : memref<2x16x1xf32, #tpu.memory_space<vmem>>, vector<1x16x1xf32>
    %48 = vector.shape_cast %47 : vector<1x16x1xf32> to vector<16x1xf32>
    %49 = vector.broadcast %48 : vector<16x1xf32> to vector<16x256xf32>
    %50 = arith.addf %46, %49 : vector<16x256xf32>
    %51 = vector.extract_strided_slice %50 {offsets = [0, 0], sizes = [8, 256], strides = [1, 1]} : vector<16x256xf32> to vector<8x256xf32>
    %52 = vector.extract_strided_slice %50 {offsets = [8, 0], sizes = [8, 256], strides = [1, 1]} : vector<16x256xf32> to vector<8x256xf32>
    %cst_33 = arith.constant 2.000000e+00 : f32
    %53 = vector.broadcast %cst_33 : f32 to vector<8x256xf32>
    %54 = arith.addf %52, %53 : vector<8x256xf32>
    %cst_34 = arith.constant -3.000000e+01 : f32
    %55 = vector.broadcast %cst_34 : f32 to vector<8x256xf32>
    %56 = arith.maximumf %54, %55 : vector<8x256xf32>
    %cst_35 = arith.constant 0.000000e+00 : f32
    %57 = vector.broadcast %cst_35 : f32 to vector<8x256xf32>
    %58 = arith.subf %57, %56 : vector<8x256xf32>
    %59 = math.exp %58 : vector<8x256xf32>
    %cst_36 = arith.constant 1.000000e+00 : f32
    %60 = vector.broadcast %cst_36 : f32 to vector<8x256xf32>
    %61 = arith.addf %60, %59 : vector<8x256xf32>
    %62 = tpu.reciprocal %61 {approx = true} : vector<8x256xf32> -> vector<8x256xf32>
    %cst_37 = arith.constant 1.000000e+00 : f32
    %63 = vector.broadcast %cst_37 : f32 to vector<8x256xf32>
    %64 = arith.addf %63, %59 : vector<8x256xf32>
    %65 = arith.mulf %64, %62 : vector<8x256xf32>
    %cst_38 = arith.constant 2.000000e+00 : f32
    %66 = vector.broadcast %cst_38 : f32 to vector<8x256xf32>
    %67 = arith.subf %66, %65 : vector<8x256xf32>
    %68 = arith.mulf %62, %67 : vector<8x256xf32>
    %69 = arith.subf %33, %51 : vector<8x256xf32>
    %70 = arith.mulf %68, %69 : vector<8x256xf32>
    %71 = arith.addf %51, %70 : vector<8x256xf32>
    %72 = math.log1p %59 : vector<8x256xf32>
    %73 = arith.addf %31, %72 : vector<8x256xf32>
    %74 = tpu.concatenate %71, %3 in 0 : vector<8x256xf32>, vector<8x256xf32> -> vector<16x256xf32>
    %c1_39 = arith.constant 1 : index
    %c0_40 = arith.constant 0 : index
    %c0_41 = arith.constant 0 : index
    %75 = vector.load %arg3[%c1_39, %c0_40, %c0_41] : memref<2x32x16xf32, #tpu.memory_space<vmem>>, vector<1x32x16xf32>
    %76 = vector.shape_cast %75 : vector<1x32x16xf32> to vector<32x16xf32>
    %cst_42 = arith.constant dense<0.000000e+00> : vector<32x256xf32>
    %77 = tpu.matmul %76, %74, %cst_42 {dimension_numbers = #tpu.dot_dimension_numbers<[1], [0], [0], [1], [0, 0, 1, 1], [], []>} : vector<32x16xf32>, vector<16x256xf32>, vector<32x256xf32> -> vector<32x256xf32>
    %c1_43 = arith.constant 1 : index
    %c0_44 = arith.constant 0 : index
    %c0_45 = arith.constant 0 : index
    %78 = vector.load %arg4[%c1_43, %c0_44, %c0_45] : memref<2x32x1xf32, #tpu.memory_space<vmem>>, vector<1x32x1xf32>
    %79 = vector.shape_cast %78 : vector<1x32x1xf32> to vector<32x1xf32>
    %80 = vector.broadcast %79 : vector<32x1xf32> to vector<32x256xf32>
    %81 = arith.addf %77, %80 : vector<32x256xf32>
    %82 = math.tanh %81 : vector<32x256xf32>
    %c1_46 = arith.constant 1 : index
    %c0_47 = arith.constant 0 : index
    %c0_48 = arith.constant 0 : index
    %83 = vector.load %arg5[%c1_46, %c0_47, %c0_48] : memref<2x16x32xf32, #tpu.memory_space<vmem>>, vector<1x16x32xf32>
    %84 = vector.shape_cast %83 : vector<1x16x32xf32> to vector<16x32xf32>
    %cst_49 = arith.constant dense<0.000000e+00> : vector<16x256xf32>
    %85 = tpu.matmul %84, %82, %cst_49 {dimension_numbers = #tpu.dot_dimension_numbers<[1], [0], [0], [1], [0, 0, 1, 1], [], []>} : vector<16x32xf32>, vector<32x256xf32>, vector<16x256xf32> -> vector<16x256xf32>
    %c1_50 = arith.constant 1 : index
    %c0_51 = arith.constant 0 : index
    %c0_52 = arith.constant 0 : index
    %86 = vector.load %arg6[%c1_50, %c0_51, %c0_52] : memref<2x16x1xf32, #tpu.memory_space<vmem>>, vector<1x16x1xf32>
    %87 = vector.shape_cast %86 : vector<1x16x1xf32> to vector<16x1xf32>
    %88 = vector.broadcast %87 : vector<16x1xf32> to vector<16x256xf32>
    %89 = arith.addf %85, %88 : vector<16x256xf32>
    %90 = vector.extract_strided_slice %89 {offsets = [0, 0], sizes = [8, 256], strides = [1, 1]} : vector<16x256xf32> to vector<8x256xf32>
    %91 = vector.extract_strided_slice %89 {offsets = [8, 0], sizes = [8, 256], strides = [1, 1]} : vector<16x256xf32> to vector<8x256xf32>
    %cst_53 = arith.constant 2.000000e+00 : f32
    %92 = vector.broadcast %cst_53 : f32 to vector<8x256xf32>
    %93 = arith.addf %91, %92 : vector<8x256xf32>
    %cst_54 = arith.constant -3.000000e+01 : f32
    %94 = vector.broadcast %cst_54 : f32 to vector<8x256xf32>
    %95 = arith.maximumf %93, %94 : vector<8x256xf32>
    %cst_55 = arith.constant 0.000000e+00 : f32
    %96 = vector.broadcast %cst_55 : f32 to vector<8x256xf32>
    %97 = arith.subf %96, %95 : vector<8x256xf32>
    %98 = math.exp %97 : vector<8x256xf32>
    %cst_56 = arith.constant 1.000000e+00 : f32
    %99 = vector.broadcast %cst_56 : f32 to vector<8x256xf32>
    %100 = arith.addf %99, %98 : vector<8x256xf32>
    %101 = tpu.reciprocal %100 {approx = true} : vector<8x256xf32> -> vector<8x256xf32>
    %cst_57 = arith.constant 1.000000e+00 : f32
    %102 = vector.broadcast %cst_57 : f32 to vector<8x256xf32>
    %103 = arith.addf %102, %98 : vector<8x256xf32>
    %104 = arith.mulf %103, %101 : vector<8x256xf32>
    %cst_58 = arith.constant 2.000000e+00 : f32
    %105 = vector.broadcast %cst_58 : f32 to vector<8x256xf32>
    %106 = arith.subf %105, %104 : vector<8x256xf32>
    %107 = arith.mulf %101, %106 : vector<8x256xf32>
    %108 = arith.subf %71, %90 : vector<8x256xf32>
    %109 = arith.mulf %107, %108 : vector<8x256xf32>
    %110 = arith.addf %90, %109 : vector<8x256xf32>
    %111 = math.log1p %98 : vector<8x256xf32>
    %112 = arith.addf %34, %111 : vector<8x256xf32>
    %c0_59 = arith.constant 0 : index
    %c0_60 = arith.constant 0 : index
    %113 = vector.load %arg7[%c0_59, %c0_60] : memref<8x8xf32, #tpu.memory_space<vmem>>, vector<8x8xf32>
    %cst_61 = arith.constant dense<0.000000e+00> : vector<8x256xf32>
    %114 = tpu.matmul %113, %112, %cst_61 {dimension_numbers = #tpu.dot_dimension_numbers<[1], [0], [0], [1], [0, 0, 1, 1], [], []>} : vector<8x8xf32>, vector<8x256xf32>, vector<8x256xf32> -> vector<8x256xf32>
    %115 = arith.addf %73, %114 : vector<8x256xf32>
    %c0_62 = arith.constant 0 : index
    %c0_63 = arith.constant 0 : index
    %c0_64 = arith.constant 0 : index
    %116 = vector.load %arg8[%c0_62, %c0_63, %c0_64] : memref<2x8x256xf32, #tpu.memory_space<vmem>>, vector<1x8x256xf32>
    %117 = vector.shape_cast %116 : vector<1x8x256xf32> to vector<8x256xf32>
    %118 = vector.shape_cast %110 : vector<8x256xf32> to vector<1x8x256xf32>
    tpu.vector_store %arg8[%c0_62, %c0_63, %c0_64], %118 {strides = array<i32>} : memref<2x8x256xf32, #tpu.memory_space<vmem>>, vector<1x8x256xf32>,
    %cst_65 = arith.constant 5.000000e-01 : f32
    %119 = vector.broadcast %cst_65 : f32 to vector<8x256xf32>
    %120 = arith.mulf %119, %110 : vector<8x256xf32>
    %121 = arith.mulf %120, %110 : vector<8x256xf32>
    %cst_66 = arith.constant -0.918938517 : f32
    %122 = vector.broadcast %cst_66 : f32 to vector<8x256xf32>
    %123 = arith.subf %122, %121 : vector<8x256xf32>
    %124 = arith.addf %115, %123 : vector<8x256xf32>
    %c1_67 = arith.constant 1 : index
    %c0_68 = arith.constant 0 : index
    %c0_69 = arith.constant 0 : index
    %125 = vector.load %arg8[%c1_67, %c0_68, %c0_69] : memref<2x8x256xf32, #tpu.memory_space<vmem>>, vector<1x8x256xf32>
    %126 = vector.shape_cast %125 : vector<1x8x256xf32> to vector<8x256xf32>
    %127 = vector.shape_cast %124 : vector<8x256xf32> to vector<1x8x256xf32>
    tpu.vector_store %arg8[%c1_67, %c0_68, %c0_69], %127 {strides = array<i32>} : memref<2x8x256xf32, #tpu.memory_space<vmem>>, vector<1x8x256xf32>,
    return
  }
  func.func @transform_0(%arg0: i32) -> (i32, i32, i32) {
    %c0_i32 = arith.constant 0 : i32
    %c0_i32_0 = arith.constant 0 : i32
    %c0_i32_1 = arith.constant 0 : i32
    return %c0_i32, %c0_i32_0, %arg0 : i32, i32, i32
  }
  func.func @transform_1(%arg0: i32) -> (i32, i32, i32) {
    %c0_i32 = arith.constant 0 : i32
    %c0_i32_0 = arith.constant 0 : i32
    %c0_i32_1 = arith.constant 0 : i32
    %c0_i32_2 = arith.constant 0 : i32
    return %c0_i32, %c0_i32_0, %c0_i32_1 : i32, i32, i32
  }
  func.func @transform_2(%arg0: i32) -> (i32, i32, i32) {
    %c0_i32 = arith.constant 0 : i32
    %c0_i32_0 = arith.constant 0 : i32
    %c0_i32_1 = arith.constant 0 : i32
    %c0_i32_2 = arith.constant 0 : i32
    return %c0_i32, %c0_i32_0, %c0_i32_1 : i32, i32, i32
  }
  func.func @transform_3(%arg0: i32) -> (i32, i32, i32) {
    %c0_i32 = arith.constant 0 : i32
    %c0_i32_0 = arith.constant 0 : i32
    %c0_i32_1 = arith.constant 0 : i32
    %c0_i32_2 = arith.constant 0 : i32
    return %c0_i32, %c0_i32_0, %c0_i32_1 : i32, i32, i32
  }
  func.func @transform_4(%arg0: i32) -> (i32, i32, i32) {
    %c0_i32 = arith.constant 0 : i32
    %c0_i32_0 = arith.constant 0 : i32
    %c0_i32_1 = arith.constant 0 : i32
    %c0_i32_2 = arith.constant 0 : i32
    return %c0_i32, %c0_i32_0, %c0_i32_1 : i32, i32, i32
  }
  func.func @transform_5(%arg0: i32) -> (i32, i32, i32) {
    %c0_i32 = arith.constant 0 : i32
    %c0_i32_0 = arith.constant 0 : i32
    %c0_i32_1 = arith.constant 0 : i32
    %c0_i32_2 = arith.constant 0 : i32
    return %c0_i32, %c0_i32_0, %c0_i32_1 : i32, i32, i32
  }
  func.func @transform_6(%arg0: i32) -> (i32, i32) {
    %c0_i32 = arith.constant 0 : i32
    %c0_i32_0 = arith.constant 0 : i32
    %c0_i32_1 = arith.constant 0 : i32
    return %c0_i32, %c0_i32_0 : i32, i32
  }
  func.func @transform_7(%arg0: i32) -> (i32, i32, i32) {
    %c0_i32 = arith.constant 0 : i32
    %c0_i32_0 = arith.constant 0 : i32
    %c0_i32_1 = arith.constant 0 : i32
    return %c0_i32, %c0_i32_0, %arg0 : i32, i32, i32
  }
}

</mosaic_0001>

<bundles_post_ra>
// kernel: tpu_custom_call.1
= control target key start
LH: loop header
LB: loop body
LE: loop exit
PB: predicated region body
PF: predicated region fallthrough
CT: control target
= control target key end

     0   :  { %v752_v2 = vmov 0   ;;  %s989_s0 = inlined_call_operand.vmem [shape: f32[2,8,256], index: 0, kind: input, shape index: {}]   ;;  %s990_s1 = inlined_call_operand.vmem [shape: f32[6,8,1], index: 1, kind: input, shape index: {}]   ;;  %s991_s2 = inlined_call_operand.vmem [shape: f32[2,32,16], index: 2, kind: input, shape index: {}]   ;;  %s992_s3 = inlined_call_operand.vmem [shape: f32[2,32,1], index: 3, kind: input, shape index: {}]   ;;  %s993_s4 = inlined_call_operand.vmem [shape: f32[2,16,32], index: 4, kind: input, shape index: {}]   ;;  %s994_s5 = inlined_call_operand.vmem [shape: f32[2,16,1], index: 5, kind: input, shape index: {}]   ;;  %s995_s6 = inlined_call_operand.vmem [shape: f32[8,8], index: 6, kind: input, shape index: {}]   ;;  %s996_s7 = inlined_call_operand.hbm [shape: f32[2,8,256], index: 7, kind: output, shape index: {}]  }
   0x1   :  { %v621_v0 = vld [vmem:[%s990_s1 + $0x18] sm:$0xff]  ;;  %v619_v1 = vld [vmem:[%s990_s1 + $0x8] sm:$0xff]  ;;  %668 = vset.pattern.permute.xlu1 %v752_v2  ;;  %667 = vset.pattern.permute.xlu0 %v752_v2 }
   0x2   :  { %61 = vperm.xlu1 %668, %v621_v0   ;;  %43 = vperm.xlu0 %667, %v619_v1   ;;  %v102_v3 = vld [vmem:[%s992_s3 + $0x18] sm:$0xff] }
   0x3   :  { %669 = vset.pattern.permute.xlu2 %v752_v2 }
   0x4   :  { %120 = vperm.xlu2 %669, %v102_v3  }
   0x5   :  { %12 = vsyncpa [#allocation3], 0  ;;  %v620_v4 = vld [vmem:[%s990_s1 + $0x10] sm:$0xff]  ;;  %v38_v5 = vld [vmem:[%s990_s1] sm:$0xff]  ;;  %v753_v23 = vmov 0.0   ;;  %vm123_vm2 = vcmask 130048  }
   0x6   :  { %v101_v6 = vld [vmem:[%s992_s3 + $0x10] sm:$0xff]  ;;  %v99_v7 = vld [vmem:[%s992_s3] sm:$0xff]  ;;  %v100_v8 = vld [vmem:[%s992_s3 + $0x8] sm:$0xff]  ;;  %vm216_vm3 = vcmask 261120   ;;  %vm538_vm7 = vcmask 64512   ;;  %s603_s19 = sshll.u32 %s996_s7, 4  ;;  %s604_s19 = int_to_ptr.hbm [resolvable:$true] %s603_s19 }
   0x7   :  { %v205_v9 = vld [vmem:[%s994_s5 + $0x8] sm:$0xff]  ;;  %v643_v10 = vld [vmem:[%s992_s3 + $0x38] sm:$0xff]  ;;  %v204_v11 = vld [vmem:[%s994_s5] sm:$0xff]  ;;  %s755_s20 = smov 256  }
   0x8   :  { %v642_v12 = vld [vmem:[%s992_s3 + $0x30] sm:$0xff]  ;;  %v640_v13 = vld [vmem:[%s992_s3 + $0x20] sm:$0xff]  ;;  %v641_v14 = vld [vmem:[%s992_s3 + $0x28] sm:$0xff] }
   0x9   :  { %v655_v15 = vld [vmem:[%s994_s5 + $0x18] sm:$0xff]  ;;  %v623_v16 = vld [vmem:[%s990_s1 + $0x28] sm:$0xff]  ;;  %v654_v17 = vld [vmem:[%s994_s5 + $0x10] sm:$0xff] }
   0xa   :  { %68 = vperm.xlu1 %668, %v620_v4   ;;  %50 = vperm.xlu0 %667, %v38_v5   ;;  %v622_v18 = vld [vmem:[%s990_s1 + $0x20] sm:$0xff]  ;;  %v854_v19 = vld [vmem:[%s989_s0 + $0x10] sm:$0xff]  ;;  %v859_v20 = vld [vmem:[%s989_s0 + $0x18] sm:$0xff] }
   0xb   :  { %150 = vmatpush.msra.mxu0 %v854_v19  ;;  %179 = vmatpush.msra.mxu1 %v859_v20  ;;  %vm32_vm0 = vcmp.gt.f32.partialorder %v854_v19, 0.0  ;;  %vm33_vm1 = vcmp.gt.f32.partialorder %v859_v20, 0.0  ;;  %v27_v30 = vld [vmem:[%s989_s0] sm:$0xff]  ;;  %v28_v31 = vld [vmem:[%s989_s0 + $0x8] sm:$0xff]  ;;  %v97_v44 = vld [vmem:[%s991_s2 + $0x10] sm:$0xff]  ;;  %s756_s0 = smov 16  }
   0xc   :  { %115 = vperm.xlu2 %669, %v101_v6   ;;  %v865_v24 = vsel %vm32_vm0, 1.0, %v753_v23  ;;  %v867_v25 = vsel %vm33_vm1, 1.0, %v753_v23  ;;  %v95_v42 = vld [vmem:[%s991_s2] sm:$0xff]  ;;  %v96_v43 = vld [vmem:[%s991_s2 + $0x8] sm:$0xff]  ;;  %v98_v45 = vld [vmem:[%s991_s2 + $0x18] sm:$0xff] }
  0x12   :  { %105 = vperm.xlu1 %668, %v99_v7   ;;  %110 = vperm.xlu0 %667, %v100_v8   ;;  %v202_v8 = vld [vmem:[%s993_s4] sm:$0xff] }
  0x14   :  { %213 = vperm.xlu2 %669, %v205_v9  }
  0x1a   :  { %342 = vperm.xlu1 %668, %v643_v10   ;;  %208 = vperm.xlu0 %667, %v204_v11   ;;  %v203_v11 = vld [vmem:[%s993_s4 + $0x8] sm:$0xff] }
  0x1c   :  { %337 = vperm.xlu2 %669, %v642_v12  }
  0x22   :  { %327 = vperm.xlu1 %668, %v640_v13   ;;  %332 = vperm.xlu0 %667, %v641_v14  }
  0x24   :  { %436 = vperm.xlu2 %669, %v655_v15  }
  0x2a   :  { %79 = vperm.xlu1 %668, %v623_v16   ;;  %431 = vperm.xlu0 %667, %v654_v17  }
  0x2c   :  { %86 = vperm.xlu2 %669, %v622_v18  }
  0x5e   :  { %v121_v50 = vpop.permute.xlu2 %120 }
  0x66   :  { %v116_v53 = vpop.permute.xlu2 %115 }
  0x6e   :  { %v214_v14 = vpop.permute.xlu2 %213 }
  0x74   :  { %v62_v21 = vpop.permute.xlu1 %61  ;;  %v44_v22 = vpop.permute.xlu0 %43 }
  0x75   :  { %v46_v26 = vmul.f32 %v865_v24, %v44_v22  ;;  %v47_v27 = vmul.f32 %v867_v25, %v44_v22  ;;  %v64_v32 = vmul.f32 %v865_v24, %v62_v21  ;;  %v65_v33 = vmul.f32 %v867_v25, %v62_v21 }
  0x7c   :  { %v69_v28 = vpop.permute.xlu1 %68  ;;  %v51_v29 = vpop.permute.xlu0 %50 }
  0x7d   :  { %v53_v34 = vadd.f32 %v51_v29, %v46_v26  ;;  %v54_v35 = vadd.f32 %v51_v29, %v47_v27  ;;  %v71_v36 = vadd.f32 %v69_v28, %v64_v32  ;;  %v72_v37 = vadd.f32 %v69_v28, %v65_v33 }
  0x7f   :  { %v91_v38 = vmul.f32 %v53_v34, %v27_v30  ;;  %v92_v39 = vmul.f32 %v54_v35, %v28_v31 }
  0x81   :  { %v879_v40 = vsub.f32 %v91_v38, %v71_v36  ;;  %v881_v41 = vsub.f32 %v92_v39, %v72_v37 }
  0x83   :  { %151 = vmatpush.msra.mxu0 %v879_v40  ;;  %180 = vmatpush.msra.mxu1 %v881_v41 }
  0x84   :  { %624 = vmatmul.msk.f32.vlgmr.msra.gmra.mxu0 %vm123_vm2, %v95_v42  ;;  %628 = vmatmul.msk.f32.vlgmr.msra.gmra.mxu1 %vm123_vm2, %v95_v42  ;;  %v111_v59 = vpop.permute.xlu0 %110  ;;  %v106_v62 = vpop.permute.xlu1 %105 }
  0x8c   :  { %625 = vmatmul.msk.f32.gmra.mxu0 %vm123_vm2, %v96_v43  ;;  %629 = vmatmul.msk.f32.gmra.mxu1 %vm123_vm2, %v96_v43  ;;  %v917_v16 = vpop.permute.xlu1 %342 }
  0x94   :  { %626 = vmatmul.msk.f32.gmra.mxu0 %vm123_vm2, %v97_v44  ;;  %630 = vmatmul.msk.f32.gmra.mxu1 %vm123_vm2, %v97_v44  ;;  %v921_v31 = vpop.permute.xlu1 %327 }
  0x9c   :  { %627 = vmatmul.msk.f32.gmra.mxu0 %vm123_vm2, %v98_v45  ;;  %631 = vmatmul.msk.f32.gmra.mxu1 %vm123_vm2, %v98_v45  ;;  %v80_v37 = vpop.permute.xlu1 %79 }
  0x9d   :  { %v82_v42 = vmul.f32 %v865_v24, %v80_v37  ;;  %v83_v43 = vmul.f32 %v867_v25, %v80_v37 }
 0x101   :  { %v153_v46 = vpop.f32.mrf.mxu0  ;;  %v182_v47 = vpop.f32.mrf.mxu1 }
 0x102   :  { %v154_v0 = vadd.f32 %v153_v46, %v106_v62  ;;  %v183_v1 = vadd.f32 %v182_v47, %v106_v62  ;;  %v209_v47 = vpop.permute.xlu0 %208 }
 0x109   :  { %v156_v48 = vpop.f32.mrf.mxu0  ;;  %v185_v49 = vpop.f32.mrf.mxu1 }
 0x10a   :  { %v157_v61 = vadd.f32 %v156_v48, %v111_v59  ;;  %v186_v63 = vadd.f32 %v185_v49, %v111_v59 }
 0x111   :  { %v159_v51 = vpop.f32.mrf.mxu0  ;;  %v188_v52 = vpop.f32.mrf.mxu1 }
 0x112   :  { %v160_v56 = vadd.f32 %v159_v51, %v116_v53  ;;  %v189_v60 = vadd.f32 %v188_v52, %v116_v53 }
 0x119   :  { %v162_v54 = vpop.f32.mrf.mxu0  ;;  %v191_v55 = vpop.f32.mrf.mxu1 }
 0x11a   :  { %v163_v57 = vadd.f32 %v162_v54, %v121_v50  ;;  %v192_v58 = vadd.f32 %v191_v55, %v121_v50 }
 0x11c   :  { %670 = vtanh.f32 %v163_v57 }
 0x11d   :  { %672 = vtanh.f32 %v192_v58 }
 0x11e   :  { %674 = vtanh.f32 %v160_v56 }
 0x11f   :  { %676 = vtanh.f32 %v189_v60 }
 0x120   :  { %678 = vtanh.f32 %v157_v61 }
 0x121   :  { %680 = vtanh.f32 %v186_v63 }
 0x122   :  { %v671_v2 = vpop.eup %670  ;;  %682 = vtanh.f32 %v154_v0 }
 0x123   :  { %v673_v3 = vpop.eup %672  ;;  %684 = vtanh.f32 %v183_v1  ;;  %235 = vmatpush.msra.mxu2 %v671_v2 }
 0x124   :  { %v675_v4 = vpop.eup %674  ;;  %258 = vmatpush.msra.mxu3 %v673_v3 }
 0x125   :  { %v677_v5 = vpop.eup %676  ;;  %236 = vmatpush.msra.mxu2 %v675_v4 }
 0x126   :  { %v679_v6 = vpop.eup %678  ;;  %259 = vmatpush.msra.mxu3 %v677_v5 }
 0x127   :  { %v681_v7 = vpop.eup %680  ;;  %237 = vmatpush.msra.mxu2 %v679_v6 }
 0x128   :  { %v683_v9 = vpop.eup %682  ;;  %260 = vmatpush.msra.mxu3 %v681_v7 }
 0x129   :  { %v685_v10 = vpop.eup %684  ;;  %238 = vmatpush.msra.mxu2 %v683_v9 }
 0x12a   :  { %261 = vmatpush.msra.mxu3 %v685_v10  ;;  %632 = vmatmul.msk.f32.vlgmr.msra.gmra.mxu2 %vm216_vm3, %v202_v8 }
 0x12b   :  { %634 = vmatmul.msk.f32.vlgmr.msra.gmra.mxu3 %vm216_vm3, %v202_v8  ;;  %371 = vmatpush.msrb.mxu2 %v854_v19 }
 0x12c   :  { %400 = vmatpush.msrb.mxu3 %v859_v20  ;;  %v919_v20 = vpop.permute.xlu2 %337 }
 0x132   :  { %633 = vmatmul.msk.f32.gmra.mxu2 %vm216_vm3, %v203_v11 }
 0x133   :  { %635 = vmatmul.msk.f32.gmra.mxu3 %vm216_vm3, %v203_v11  ;;  %v636_v11 = vld [vmem:[%s991_s2 + $0x20] sm:$0xff] }
 0x134   :  { %v923_v32 = vpop.permute.xlu2 %436 }
 0x13c   :  { %v87_v44 = vpop.permute.xlu2 %86 }
 0x13d   :  { %v89_v55 = vadd.f32 %v87_v44, %v82_v42  ;;  %v90_v59 = vadd.f32 %v87_v44, %v83_v43 }
 0x1ad   :  { %v240_v12 = vpop.f32.mrf.mxu2 }
 0x1ae   :  { %v263_v13 = vpop.f32.mrf.mxu3  ;;  %v241_v51 = vadd.f32 %v240_v12, %v209_v47  ;;  %v638_v12 = vld [vmem:[%s991_s2 + $0x30] sm:$0xff] }
 0x1af   :  { %v264_v56 = vadd.f32 %v263_v13, %v209_v47  ;;  %v639_v13 = vld [vmem:[%s991_s2 + $0x38] sm:$0xff] }
 0x1b0   :  { %v289_v0 = vsub.f32 %v879_v40, %v241_v51 }
 0x1b1   :  { %v290_v3 = vsub.f32 %v881_v41, %v264_v56  ;;  %v637_v41 = vld [vmem:[%s991_s2 + $0x28] sm:$0xff] }
 0x1b5   :  { %v243_v15 = vpop.f32.mrf.mxu2 }
 0x1b6   :  { %v244_v17 = vadd.f32 %v243_v15, %v214_v14  ;;  %v266_v18 = vpop.f32.mrf.mxu3 }
 0x1b7   :  { %v267_v21 = vadd.f32 %v266_v18, %v214_v14 }
 0x1b8   :  { %v269_v19 = vadd.f32 2.0, %v244_v17 }
 0x1b9   :  { %v270_v22 = vadd.f32 2.0, %v267_v21 }
 0x1ba   :  { %v271_v23 = vmax.f32 %v269_v19, -30.0 }
 0x1bb   :  { %v272_v26 = vmax.f32 %v270_v22, -30.0 }
 0x1bc   :  { %v273_v27 = vsub.f32 0.0, %v271_v23 }
 0x1bd   :  { %v274_v28 = vsub.f32 0.0, %v272_v26 }
 0x1be   :  { %v275_v29 = vmul.f32 1.442695, %v273_v27 }
 0x1bf   :  { %v277_v30 = vmul.f32 1.442695, %v274_v28  ;;  %v333_v28 = vpop.permute.xlu0 %332 }
 0x1c0   :  { %686 = vpow2.f32 %v275_v29 }
 0x1c1   :  { %688 = vpow2.f32 %v277_v30 }
 0x1c6   :  { %v687_v33 = vpop.eup %686 }
 0x1c7   :  { %v689_v34 = vpop.eup %688  ;;  %v279_v35 = vadd.f32 1.0, %v687_v33  ;;  %v298_v38 = vmul.f32 -0.5, %v687_v33  ;;  %v301_v48 = vand.u32 2147483647, %v687_v33 }
 0x1c8   :  { %v280_v36 = vadd.f32 1.0, %v689_v34  ;;  %v307_v39 = vmul.f32 -0.5, %v689_v34  ;;  %v310_v53 = vand.u32 2147483647, %v689_v34 }
 0x1c9   :  { %690 = vrcp.f32 %v279_v35  ;;  %v299_v45 = vadd.f32 1.0, %v298_v38  ;;  %vm302_vm4 = vcmp.lt.f32.partialorder %v301_v48, 0.0004427343 }
 0x1ca   :  { %692 = vrcp.f32 %v280_v36  ;;  %v308_v49 = vadd.f32 1.0, %v307_v39  ;;  %vm311_vm5 = vcmp.lt.f32.partialorder %v310_v53, 0.0004427343 }
 0x1cb   :  { %694 = vlog2.f32 %v279_v35  ;;  %v300_v61 = vmul.f32 %v687_v33, %v299_v45  ;;  %v653_v45 = vld [vmem:[%s993_s4 + $0x18] sm:$0xff] }
 0x1cc   :  { %696 = vlog2.f32 %v280_v36  ;;  %v309_v63 = vmul.f32 %v689_v34, %v308_v49 }
 0x1cf   :  { %v691_v46 = vpop.eup %690 }
 0x1d0   :  { %v693_v50 = vpop.eup %692  ;;  %v283_v52 = vmul.f32 %v691_v46, %v279_v35 }
 0x1d1   :  { %v695_v54 = vpop.eup %694  ;;  %v284_v57 = vmul.f32 %v693_v50, %v280_v36 }
 0x1d2   :  { %v697_v58 = vpop.eup %696  ;;  %v285_v60 = vsub.f32 2.0, %v283_v52  ;;  %v297_v24 = vmul.f32 0.6931472, %v695_v54 }
 0x1d3   :  { %v286_v25 = vsub.f32 2.0, %v284_v57  ;;  %v306_v62 = vmul.f32 0.6931472, %v697_v58 }
 0x1d4   :  { %v287_v1 = vmul.f32 %v691_v46, %v285_v60  ;;  %v303_v2 = vsel %vm302_vm4, %v300_v61, %v297_v24 }
 0x1d5   :  { %v288_v4 = vmul.f32 %v693_v50, %v286_v25  ;;  %v929_v5 = vadd.f32 %v303_v2, %v89_v55  ;;  %v312_v6 = vsel %vm311_vm5, %v309_v63, %v306_v62  ;;  %v432_v2 = vpop.permute.xlu0 %431 }
 0x1d6   :  { %v291_v7 = vmul.f32 %v289_v0, %v287_v1  ;;  %v931_v8 = vadd.f32 %v312_v6, %v90_v59 }
 0x1d7   :  { %v292_v9 = vmul.f32 %v290_v3, %v288_v4 }
 0x1d8   :  { %v933_v10 = vadd.f32 %v291_v7, %v241_v51 }
 0x1d9   :  { %v938_v40 = vadd.f32 %v292_v9, %v264_v56 }
 0x1da   :  { %372 = vmatpush.msrb.mxu2 %v933_v10 }
 0x1db   :  { %401 = vmatpush.msrb.mxu3 %v938_v40  ;;  %644 = vmatmul.msk.f32.vlgmr.msrb.gmra.mxu2 %vm123_vm2, %v636_v11 }
 0x1dc   :  { %648 = vmatmul.msk.f32.vlgmr.msrb.gmra.mxu3 %vm123_vm2, %v636_v11 }
 0x1e3   :  { %645 = vmatmul.msk.f32.gmra.mxu2 %vm123_vm2, %v637_v41 }
 0x1e4   :  { %649 = vmatmul.msk.f32.gmra.mxu3 %vm123_vm2, %v637_v41 }
 0x1eb   :  { %646 = vmatmul.msk.f32.gmra.mxu2 %vm123_vm2, %v638_v12 }
 0x1ec   :  { %650 = vmatmul.msk.f32.gmra.mxu3 %vm123_vm2, %v638_v12 }
 0x1f3   :  { %647 = vmatmul.msk.f32.gmra.mxu2 %vm123_vm2, %v639_v13 }
 0x1f4   :  { %651 = vmatmul.msk.f32.gmra.mxu3 %vm123_vm2, %v639_v13 }
 0x25e   :  { %v374_v14 = vpop.f32.mrf.mxu2 }
 0x25f   :  { %v403_v15 = vpop.f32.mrf.mxu3  ;;  %v375_v35 = vadd.f32 %v374_v14, %v921_v31 }
 0x260   :  { %v404_v36 = vadd.f32 %v403_v15, %v921_v31  ;;  %v652_v31 = vld [vmem:[%s993_s4 + $0x10] sm:$0xff]  ;;  %v537_v15 = vld [vmem:[%s995_s6] sm:$0xff]  ;;  %s754_s6 = smov [#allocation2]  }
 0x261   :  { %s601_s5 = sshll.u32 %s754_s6, 4  ;;  %s602_s5 = int_to_ptr.vmem [resolvable:$true] %s601_s5 }
 0x266   :  { %v377_v17 = vpop.f32.mrf.mxu2 }
 0x267   :  { %v406_v18 = vpop.f32.mrf.mxu3  ;;  %v378_v33 = vadd.f32 %v377_v17, %v333_v28 }
 0x268   :  { %v407_v34 = vadd.f32 %v406_v18, %v333_v28 }
 0x26e   :  { %v380_v21 = vpop.f32.mrf.mxu2 }
 0x26f   :  { %v409_v19 = vpop.f32.mrf.mxu3  ;;  %v381_v23 = vadd.f32 %v380_v21, %v919_v20 }
 0x270   :  { %v410_v29 = vadd.f32 %v409_v19, %v919_v20 }
 0x276   :  { %v383_v22 = vpop.f32.mrf.mxu2 }
 0x277   :  { %v384_v26 = vadd.f32 %v383_v22, %v917_v16  ;;  %v412_v27 = vpop.f32.mrf.mxu3 }
 0x278   :  { %v413_v30 = vadd.f32 %v412_v27, %v917_v16 }
 0x279   :  { %698 = vtanh.f32 %v384_v26 }
 0x27a   :  { %700 = vtanh.f32 %v413_v30 }
 0x27b   :  { %702 = vtanh.f32 %v381_v23 }
 0x27c   :  { %704 = vtanh.f32 %v410_v29 }
 0x27d   :  { %706 = vtanh.f32 %v378_v33 }
 0x27e   :  { %708 = vtanh.f32 %v407_v34 }
 0x27f   :  { %v699_v37 = vpop.eup %698  ;;  %710 = vtanh.f32 %v375_v35 }
 0x280   :  { %v701_v38 = vpop.eup %700  ;;  %712 = vtanh.f32 %v404_v36  ;;  %457 = vmatpush.msrb.mxu0 %v699_v37 }
 0x281   :  { %v703_v20 = vpop.eup %702  ;;  %480 = vmatpush.msrb.mxu1 %v701_v38 }
 0x282   :  { %v705_v16 = vpop.eup %704  ;;  %458 = vmatpush.msrb.mxu0 %v703_v20 }
 0x283   :  { %v707_v39 = vpop.eup %706  ;;  %481 = vmatpush.msrb.mxu1 %v705_v16 }
 0x284   :  { %v709_v42 = vpop.eup %708  ;;  %459 = vmatpush.msrb.mxu0 %v707_v39 }
 0x285   :  { %v711_v43 = vpop.eup %710  ;;  %482 = vmatpush.msrb.mxu1 %v709_v42 }
 0x286   :  { %v713_v44 = vpop.eup %712  ;;  %460 = vmatpush.msrb.mxu0 %v711_v43 }
 0x287   :  { %483 = vmatpush.msrb.mxu1 %v713_v44  ;;  %656 = vmatmul.msk.f32.vlgmr.msrb.gmra.mxu0 %vm216_vm3, %v652_v31 }
 0x288   :  { %658 = vmatmul.msk.f32.vlgmr.msrb.gmra.mxu1 %vm216_vm3, %v652_v31 }
 0x28f   :  { %657 = vmatmul.msk.f32.gmra.mxu0 %vm216_vm3, %v653_v45 }
 0x290   :  { %659 = vmatmul.msk.f32.gmra.mxu1 %vm216_vm3, %v653_v45 }
 0x304   :  { %v462_v46 = vpop.f32.mrf.mxu0 }
 0x305   :  { %v485_v47 = vpop.f32.mrf.mxu1  ;;  %v463_v6 = vadd.f32 %v462_v46, %v432_v2 }
 0x306   :  { %v486_v41 = vadd.f32 %v485_v47, %v432_v2 }
 0x307   :  { %v511_v23 = vsub.f32 %v933_v10, %v463_v6 }
 0x308   :  { %v512_v29 = vsub.f32 %v938_v40, %v486_v41 }
 0x30c   :  { %v465_v48 = vpop.f32.mrf.mxu0 }
 0x30d   :  { %v466_v49 = vadd.f32 %v465_v48, %v923_v32  ;;  %v488_v50 = vpop.f32.mrf.mxu1 }
 0x30e   :  { %v489_v51 = vadd.f32 %v488_v50, %v923_v32 }
 0x30f   :  { %v491_v52 = vadd.f32 2.0, %v466_v49 }
 0x310   :  { %v492_v53 = vadd.f32 2.0, %v489_v51 }
 0x311   :  { %v493_v54 = vmax.f32 %v491_v52, -30.0 }
 0x312   :  { %v494_v55 = vmax.f32 %v492_v53, -30.0 }
 0x313   :  { %v495_v56 = vsub.f32 0.0, %v493_v54 }
 0x314   :  { %v496_v57 = vsub.f32 0.0, %v494_v55 }
 0x315   :  { %v497_v58 = vmul.f32 1.442695, %v495_v56 }
 0x316   :  { %v499_v59 = vmul.f32 1.442695, %v496_v57 }
 0x317   :  { %714 = vpow2.f32 %v497_v58 }
 0x318   :  { %716 = vpow2.f32 %v499_v59 }
 0x31d   :  { %v715_v60 = vpop.eup %714 }
 0x31e   :  { %v717_v24 = vpop.eup %716  ;;  %v501_v61 = vadd.f32 1.0, %v715_v60  ;;  %v520_v62 = vmul.f32 -0.5, %v715_v60  ;;  %v523_v0 = vand.u32 2147483647, %v715_v60 }
 0x31f   :  { %v502_v25 = vadd.f32 1.0, %v717_v24  ;;  %v529_v63 = vmul.f32 -0.5, %v717_v24  ;;  %v532_v7 = vand.u32 2147483647, %v717_v24 }
 0x320   :  { %718 = vrcp.f32 %v501_v61  ;;  %v521_v32 = vadd.f32 1.0, %v520_v62  ;;  %vm524_vm6 = vcmp.lt.f32.partialorder %v523_v0, 0.0004427343 }
 0x321   :  { %720 = vlog2.f32 %v501_v61  ;;  %v530_v3 = vadd.f32 1.0, %v529_v63  ;;  %vm533_vm8 = vcmp.lt.f32.partialorder %v532_v7, 0.0004427343 }
 0x322   :  { %722 = vrcp.f32 %v502_v25  ;;  %v522_v13 = vmul.f32 %v715_v60, %v521_v32 }
 0x323   :  { %724 = vlog2.f32 %v502_v25  ;;  %v531_v22 = vmul.f32 %v717_v24, %v530_v3 }
 0x326   :  { %v719_v1 = vpop.eup %718 }
 0x327   :  { %v721_v4 = vpop.eup %720  ;;  %v505_v9 = vmul.f32 %v719_v1, %v501_v61 }
 0x328   :  { %v723_v11 = vpop.eup %722  ;;  %v519_v12 = vmul.f32 0.6931472, %v721_v4 }
 0x329   :  { %v725_v14 = vpop.eup %724  ;;  %v507_v17 = vsub.f32 2.0, %v505_v9  ;;  %v506_v18 = vmul.f32 %v723_v11, %v502_v25 }
 0x32a   :  { %v525_v21 = vsel %vm524_vm6, %v522_v13, %v519_v12  ;;  %v528_v19 = vmul.f32 0.6931472, %v725_v14 }
 0x32b   :  { %557 = vmatpush.msra.mxu0 %v525_v21  ;;  %v509_v26 = vmul.f32 %v719_v1, %v507_v17  ;;  %v508_v27 = vsub.f32 2.0, %v506_v18 }
 0x32c   :  { %v534_v28 = vsel %vm533_vm8, %v531_v22, %v528_v19  ;;  %660 = vmatmul.msk.f32.vlgmr.msra.gmra.mxu0 %vm538_vm7, %v537_v15 }
 0x32d   :  { %577 = vmatpush.msra.mxu1 %v534_v28  ;;  %v513_v30 = vmul.f32 %v511_v23, %v509_v26  ;;  %v510_v33 = vmul.f32 %v723_v11, %v508_v27 }
 0x32e   :  { %661 = vmatmul.msk.f32.vlgmr.msra.gmra.mxu1 %vm538_vm7, %v537_v15 }
 0x32f   :  { %v515_v34 = vadd.f32 %v513_v30, %v463_v6  ;;  %v514_v35 = vmul.f32 %v512_v29, %v510_v33 }
 0x331   :  { %584 = vst [vmem:[#allocation2] sm:$0xff] %v515_v34  ;;  %v516_v36 = vadd.f32 %v514_v35, %v486_v41  ;;  %v586_v10 = vmul.f32 0.5, %v515_v34 }
 0x333   :  { %585 = vst [vmem:[#allocation2 + $0x8] sm:$0xff] %v516_v36  ;;  %v587_v37 = vmul.f32 0.5, %v516_v36  ;;  %v588_v38 = vmul.f32 %v586_v10, %v515_v34 }
 0x335   :  { %v589_v20 = vmul.f32 %v587_v37, %v516_v36  ;;  %v590_v42 = vsub.f32 -0.9189385, %v588_v38 }
 0x337   :  { %v591_v44 = vsub.f32 -0.9189385, %v589_v20 }
 0x3a9   :  { %v559_v16 = vpop.f32.mrf.mxu0 }
 0x3aa   :  { %v582_v39 = vadd.f32 %v559_v16, %v929_v5 }
 0x3ab   :  { %v579_v40 = vpop.f32.mrf.mxu1 }
 0x3ac   :  { %v592_v31 = vadd.f32 %v590_v42, %v582_v39  ;;  %v583_v43 = vadd.f32 %v579_v40, %v931_v8 }
 0x3ae   :  { %595 = vst [vmem:[#allocation2 + $0x10] sm:$0xff] %v592_v31  ;;  %v593_v45 = vadd.f32 %v591_v44, %v583_v43 }
 0x3b0   :  { %596 = vst [vmem:[#allocation2 + $0x18] sm:$0xff] %v593_v45 }
 0x3b1   :  { %609 = dma.vmem_to_hbm [thread:$0]  %s602_s5, 512, %s604_s19, [#allocation3], %s755_s20, %s755_s20, %s756_s0  }
 0x3b2   :  { %750 = dma.done.wait [#allocation3], 512  }
 0x3b3   :  { %751 = vsyncadd [#allocation3], 4294966784 }
 0x3b4   :  { %614 = vsyncpa [#allocation3], 1 }

</bundles_post_ra>
